<compile_context>
chip_gen: v7x
topology: tpu7x:2x2x1
jax: 0.10.0
libtpu: 0.0.40
codegen_flags: <defaults>
</compile_context>

<pallas_src>
import jax
import jax.numpy as jnp
from jax import lax
from jax.experimental import pallas as pl
from jax.experimental.pallas import tpu as pltpu


# ------------------------------------------------------------------
# helpers
# ------------------------------------------------------------------
def _round_up(n, m):
    return (n + m - 1) // m * m


def _pick_tile(n, prefs):
    for p in prefs:
        if n >= p and n % p == 0:
            return p
    return n


def _rows_pad_tile(m, pref=512):
    """Pad row count and choose a row-tile size (multiple of 8, one tile if it fits)."""
    if m <= pref:
        mp = _round_up(m, 8)
        return mp, mp
    return _round_up(m, pref), pref


_MM_COMPILER_PARAMS = pltpu.CompilerParams(
    dimension_semantics=("parallel", "arbitrary"),   # outer N-tiles may split cores;
    vmem_limit_bytes=32 * 1024 * 1024)               # inner row-tiles keep W resident.


# ------------------------------------------------------------------
# Kernel A: tiled  y = x @ W + b   (bf16 MXU operands, f32 accumulation)
# Grid is (N//tn OUTER, M//tm INNER) so the weight block stays VMEM-resident
# across all row tiles (Pallas elides the DMA when the block index is unchanged).
# ------------------------------------------------------------------
def _matmul_bias_kernel(x_ref, w_ref, b_ref, o_ref):
    o_ref[...] = (jnp.dot(x_ref[...], w_ref[...],
                          preferred_element_type=jnp.float32)
                  + b_ref[...])


def matmul_bias(x, w, b, *, tm_pref=512, tn_pref=512):
    """x: (M, K) any-float, w: (K, N) bf16, b: (1, N) f32 -> (M, N) f32. N is 128-mult."""
    M, K = x.shape
    N = w.shape[1]
    Mp, tm = _rows_pad_tile(M, tm_pref)
    tn = _pick_tile(N, (tn_pref, 256, 128))
    xp = jnp.pad(x.astype(jnp.bfloat16), ((0, Mp - M), (0, 0)))
    out = pl.pallas_call(
        _matmul_bias_kernel,
        out_shape=jax.ShapeDtypeStruct((Mp, N), jnp.float32),
        grid=(N // tn, Mp // tm),                       # N outer, rows inner
        in_specs=[pl.BlockSpec((tm, K), lambda j, i: (i, 0)),
                  pl.BlockSpec((K, tn), lambda j, i: (0, j)),   # resident across i
                  pl.BlockSpec((1, tn), lambda j, i: (0, j))],
        out_specs=pl.BlockSpec((tm, tn), lambda j, i: (i, j)),
        compiler_params=_MM_COMPILER_PARAMS,
    )(xp, w, b)
    return out[:M]


# ------------------------------------------------------------------
# Kernel B: LSTM recurrence, Tt timesteps per grid step, h/c in VMEM scratch.
# PyTorch gate order: i, f, g, o.  Gate slices are lane-aligned (H padded to 128).
# ------------------------------------------------------------------
def _lstm_block_kernel(gx_ref, whh_ref, h0_ref, c0_ref, out_ref, h_sc, c_sc):
    @pl.when(pl.program_id(0) == 0)
    def _():
        h_sc[...] = h0_ref[...]
        c_sc[...] = c0_ref[...]

    Hd = c_sc.shape[-1]
    whh = whh_ref[...]                                   # (Hp, 4Hp) bf16, resident

    def step(t, carry):
        gates = gx_ref[t] + jnp.dot(h_sc[...], whh,
                                    preferred_element_type=jnp.float32)   # (Bp, 4Hp) f32
        i_g = jax.nn.sigmoid(gates[:, 0 * Hd:1 * Hd])
        f_g = jax.nn.sigmoid(gates[:, 1 * Hd:2 * Hd])
        g_g = jnp.tanh(gates[:, 2 * Hd:3 * Hd])
        o_g = jax.nn.sigmoid(gates[:, 3 * Hd:4 * Hd])
        c_new = f_g * c_sc[...] + i_g * g_g
        h_new = (o_g * jnp.tanh(c_new)).astype(jnp.bfloat16)
        c_sc[...] = c_new
        h_sc[...] = h_new
        out_ref[t] = h_new
        return carry

    lax.fori_loop(0, gx_ref.shape[0], step, 0, unroll=True)


def lstm_forward(gx, w_hh, h0_bf16, c0, *, tt_pref=8):
    """gx: (T, Bp, 4Hp) f32 (precomputed x@W_ih + b), w_hh: (Hp, 4Hp) bf16,
    h0: (Bp, Hp) bf16, c0: (Bp, Hp) f32  ->  (T, Bp, Hp) bf16."""
    T, Bp, H4 = gx.shape
    Hp = c0.shape[-1]
    Tt = min(tt_pref, T)
    Tp = _round_up(T, Tt)
    if Tp != T:
        gx = jnp.pad(gx, ((0, Tp - T), (0, 0), (0, 0)))  # padded steps: outputs discarded
    out = pl.pallas_call(
        _lstm_block_kernel,
        out_shape=jax.ShapeDtypeStruct((Tp, Bp, Hp), jnp.bfloat16),
        grid=(Tp // Tt,),
        in_specs=[pl.BlockSpec((Tt, Bp, H4), lambda t: (t, 0, 0)),
                  pl.BlockSpec((Hp, H4), lambda t: (0, 0)),
                  pl.BlockSpec((Bp, Hp), lambda t: (0, 0)),
                  pl.BlockSpec((Bp, Hp), lambda t: (0, 0))],
        out_specs=pl.BlockSpec((Tt, Bp, Hp), lambda t: (t, 0, 0)),
        scratch_shapes=[pltpu.VMEM((Bp, Hp), jnp.bfloat16),   # h carry (bf16 halves traffic)
                        pltpu.VMEM((Bp, Hp), jnp.float32)],   # c carry (f32 for accuracy)
        compiler_params=pltpu.CompilerParams(
            dimension_semantics=("arbitrary",)),
    )(gx, w_hh, h0_bf16, c0)
    return out[:T]


# ------------------------------------------------------------------
# Kernel C: classifier + length mask.  Grid (vocab-tiles OUTER, row-tiles INNER)
# keeps the Hp x tn weight block resident across all row tiles.
# ------------------------------------------------------------------
def _classifier_kernel(x_ref, w_ref, b_ref, mask_ref, o_ref):
    scores = (jnp.dot(x_ref[...], w_ref[...],
                      preferred_element_type=jnp.float32)
              + b_ref[...])
    o_ref[...] = scores * mask_ref[...]


def classify(h_flat, valid, w_cls, b_cls, *, tm_pref=512, tn_pref=512):
    """h_flat: (M, Hp) bf16, valid: (M,) f32 {0,1}, w_cls: (Hp, Vp) bf16 -> (M, Vp) f32."""
    M, Hp = h_flat.shape
    Vp = w_cls.shape[1]
    Mp, tm = _rows_pad_tile(M, tm_pref)
    tn = _pick_tile(Vp, (tn_pref, 256, 128))

    hp = jnp.pad(h_flat, ((0, Mp - M), (0, 0)))
    mask2d = jnp.pad(valid, (0, Mp - M)).reshape(Mp, 1)

    out = pl.pallas_call(
        _classifier_kernel,
        out_shape=jax.ShapeDtypeStruct((Mp, Vp), jnp.float32),
        grid=(Vp // tn, Mp // tm),                      # vocab outer, rows inner
        in_specs=[pl.BlockSpec((tm, Hp), lambda j, i: (i, 0)),
                  pl.BlockSpec((Hp, tn), lambda j, i: (0, j)),   # resident across i
                  pl.BlockSpec((1, tn), lambda j, i: (0, j)),
                  pl.BlockSpec((tm, 1), lambda j, i: (i, 0))],
        out_specs=pl.BlockSpec((tm, tn), lambda j, i: (i, j)),
        compiler_params=_MM_COMPILER_PARAMS,
    )(hp, w_cls, b_cls, mask2d)
    return out[:M]


# ------------------------------------------------------------------
# Parameter init: logical shapes mirror the PyTorch module; weights padded to
# 128-lane multiples (per-gate padding for the 4H axis), pre-cast to bf16 once.
# ------------------------------------------------------------------
def init_params(key, vocab_size, embedding_dim, decoder_dim, encoder_dim):
    Ep = _round_up(embedding_dim, 128)
    Hp = _round_up(decoder_dim, 128)
    Vp = _round_up(vocab_size, 128)
    ks = jax.random.split(key, 9)
    u = lambda k, shape, a: jax.random.uniform(k, shape, jnp.float32, -a, a)

    def pad2(x, shape):
        return jnp.pad(x, [(0, s - d) for d, s in zip(x.shape, shape)])

    def pad_gates(w, row_pad):  # (R, 4H) -> (R+row_pad, 4Hp), per-gate column padding
        R = w.shape[0]
        w4 = w.reshape(R, 4, decoder_dim)
        w4 = jnp.pad(w4, ((0, row_pad), (0, 0), (0, Hp - decoder_dim)))
        return w4.reshape(R + row_pad, 4 * Hp)

    w_init_h = pad2(u(ks[1], (encoder_dim, decoder_dim), 0.05), (encoder_dim, Hp))
    b_init_h = pad2(u(ks[2], (1, decoder_dim), 0.05), (1, Hp))
    w_init_c = pad2(u(ks[3], (encoder_dim, decoder_dim), 0.05), (encoder_dim, Hp))
    b_init_c = pad2(u(ks[4], (1, decoder_dim), 0.05), (1, Hp))

    return dict(
        embedding=pad2(u(ks[0], (vocab_size, embedding_dim), 0.1),
                       (vocab_size, Ep)).astype(jnp.bfloat16),
        # init_h / init_c fused: one (Denc, 2Hp) matmul, sliced afterwards.
        w_init_hc=jnp.concatenate([w_init_h, w_init_c], axis=1).astype(jnp.bfloat16),
        b_init_hc=jnp.concatenate([b_init_h, b_init_c], axis=1),
        w_ih=pad_gates(u(ks[5], (embedding_dim, 4 * decoder_dim), 0.1),
                       Ep - embedding_dim).astype(jnp.bfloat16),
        w_hh=pad_gates(u(ks[6], (decoder_dim, 4 * decoder_dim), 0.1),
                       Hp - decoder_dim).astype(jnp.bfloat16),
        # NOTE: single uniform draw instead of b_ih + b_hh sum (init-distribution nit only).
        b_lstm=pad_gates(u(ks[7], (1, 4 * decoder_dim), 0.1), 0),
        w_cls=pad2(u(ks[8], (decoder_dim, vocab_size), 0.1), (Hp, Vp)).astype(jnp.bfloat16),
        b_cls=jnp.zeros((1, Vp), jnp.float32),
        vocab_size=vocab_size, embedding_dim=embedding_dim,
        decoder_dim=decoder_dim, encoder_dim=encoder_dim,
        Ep=Ep, Hp=Hp, Vp=Vp,
        # NOTE: f_beta / sigmoid exist in the PyTorch module but are unused in forward().
    )


# ------------------------------------------------------------------
# Forward pass (mirrors Decoder.forward)
# ------------------------------------------------------------------
def decoder_forward(params, encoder_out, encoded_captions, caption_lengths):
    B = encoder_out.shape[0]
    T = encoded_captions.shape[1]
    enc_dim = encoder_out.shape[-1]
    V = params['vocab_size']
    Ep, Hp, Vp = params['Ep'], params['Hp'], params['Vp']
    Bp = _round_up(B, 8)

    enc = encoder_out.reshape(B, -1, enc_dim)                         # (B, num_pixels, Denc)
    cap_len = caption_lengths.reshape(B).astype(jnp.int32)
    sort_ind = jnp.argsort(-cap_len)                                  # descending sort
    cap_len_sorted = cap_len[sort_ind]
    enc = enc[sort_ind]
    caps_sorted = encoded_captions[sort_ind]
    decode_lengths = cap_len_sorted - 1

    # mean over pixels in XLA (never DMAs the full feature map into VMEM)
    mean_enc = jnp.mean(enc, axis=1)                                  # (B, Denc) f32
    mean_enc_p = jnp.pad(mean_enc, ((0, Bp - B), (0, 0)))

    # fused init_h / init_c
    hc0 = matmul_bias(mean_enc_p, params['w_init_hc'], params['b_init_hc'])  # (Bp, 2Hp)
    h0 = hc0[:, :Hp].astype(jnp.bfloat16)
    c0 = hc0[:, Hp:]

    # time-major bf16 embedding gather (padded E lanes of the table are zero)
    emb_tm = jnp.take(params['embedding'], caps_sorted.T, axis=0)     # (T, B, Ep) bf16
    emb_tm = jnp.pad(emb_tm, ((0, 0), (0, Bp - B), (0, 0)))           # (T, Bp, Ep)

    # Hoisted input projection: one big MXU matmul over all timesteps (f32 gates).
    gx = matmul_bias(emb_tm.reshape(T * Bp, Ep), params['w_ih'], params['b_lstm'])
    gx = gx.reshape(T, Bp, 4 * Hp)

    out_tm = lstm_forward(gx, params['w_hh'], h0, c0)                 # (T, Bp, Hp) bf16
    out = jnp.transpose(out_tm, (1, 0, 2))                            # (Bp, T, Hp) bf16 (cheap)

    # Classifier over a static T-1 horizon; positions >= decode_length stay exactly 0
    # (matches PyTorch's zero-initialized `predictions`; no host sync on max length).
    Tm1 = T - 1
    h_flat = out[:, :Tm1, :].reshape(Bp * Tm1, Hp)
    dlen_p = jnp.pad(decode_lengths, (0, Bp - B))
    valid = (jnp.arange(Tm1, dtype=jnp.int32)[None, :] < dlen_p[:, None])
    valid = valid.astype(jnp.float32).reshape(Bp * Tm1)

    # Dropout(p=0.3) -> identity (eval-mode semantics).
    preds = classify(h_flat, valid, params['w_cls'], params['b_cls'])  # (Bp*Tm1, Vp) f32
    preds = preds.reshape(Bp, Tm1, Vp)[:B, :, :V]
    return preds, caps_sorted, decode_lengths, sort_ind


if __name__ == "__main__":
    key = jax.random.PRNGKey(0)
    B, enc_size, encoder_dim = 2, 4, 32
    embedding_dim, decoder_dim, vocab_size = 16, 32, 50
    max_cap_len = 8

    kp, k1, k2 = jax.random.split(key, 3)
    params = init_params(kp, vocab_size, embedding_dim, decoder_dim, encoder_dim)

    encoder_out = jax.random.normal(
        k1, (B, enc_size, enc_size, encoder_dim), jnp.float32)        # (B, H, W, Denc)
    encoded_captions = jax.random.randint(
        k2, (B, max_cap_len), 0, vocab_size, dtype=jnp.int32)         # (B, T)
    caption_lengths = jnp.array([[6], [8]], dtype=jnp.int32)          # (B, 1)

    preds, caps_sorted, decode_lengths, sort_ind = decoder_forward(
        params, encoder_out, encoded_captions, caption_lengths)
    jax.block_until_ready(preds)

    assert preds.shape == (B, max_cap_len - 1, vocab_size)
    # second sorted element has caption length 6 -> decode length 5 -> tail must be zero
    assert float(jnp.max(jnp.abs(preds[1, 5:, :]))) == 0.0
    assert float(jnp.max(jnp.abs(preds[0, :7, :]))) > 0.0
    print("KERNEL_OK")
</pallas_src>

<mosaic_0001>
module attributes {stable_mosaic.version = 11 : i64} {
  func.func @_matmul_bias_kernel(%arg0: i32, %arg1: i32, %arg2: memref<8x32xbf16, #tpu.memory_space<vmem>>, %arg3: memref<32x256xbf16, #tpu.memory_space<vmem>>, %arg4: memref<1x256xf32, #tpu.memory_space<vmem>>, %arg5: memref<8x256xf32, #tpu.memory_space<vmem>>) attributes {dimension_semantics = [#tpu.dimension_semantics<parallel>, #tpu.dimension_semantics<arbitrary>], iteration_bounds = array<i64: 1, 1>, scalar_prefetch = 0 : i64, scratch_operands = 0 : i64, tpu.core_type = #tpu.core_type<tc>, window_params = [{transform_indices = @transform_0, window_bounds = array<i64: 8, 32>}, {transform_indices = @transform_1, window_bounds = array<i64: 32, 256>}, {transform_indices = @transform_2, window_bounds = array<i64: 1, 256>}, {transform_indices = @transform_3, window_bounds = array<i64: 8, 256>}]} {
    %c0 = arith.constant 0 : index
    %c0_0 = arith.constant 0 : index
    %0 = vector.load %arg2[%c0, %c0_0] : memref<8x32xbf16, #tpu.memory_space<vmem>>, vector<8x32xbf16>
    %c0_1 = arith.constant 0 : index
    %c0_2 = arith.constant 0 : index
    %1 = vector.load %arg3[%c0_1, %c0_2] : memref<32x256xbf16, #tpu.memory_space<vmem>>, vector<32x256xbf16>
    %cst = arith.constant dense<0.000000e+00> : vector<8x256xf32>
    %2 = tpu.matmul %0, %1, %cst {dimension_numbers = #tpu.dot_dimension_numbers<[1], [0], [0], [1], [0, 0, 1, 1], [], []>} : vector<8x32xbf16>, vector<32x256xbf16>, vector<8x256xf32> -> vector<8x256xf32>
    %c0_3 = arith.constant 0 : index
    %c0_4 = arith.constant 0 : index
    %3 = vector.load %arg4[%c0_3, %c0_4] : memref<1x256xf32, #tpu.memory_space<vmem>>, vector<1x256xf32>
    %4 = vector.broadcast %3 : vector<1x256xf32> to vector<8x256xf32>
    %5 = arith.addf %2, %4 : vector<8x256xf32>
    %c0_5 = arith.constant 0 : index
    %c0_6 = arith.constant 0 : index
    %6 = vector.load %arg5[%c0_5, %c0_6] : memref<8x256xf32, #tpu.memory_space<vmem>>, vector<8x256xf32>
    tpu.vector_store %arg5[%c0_5, %c0_6], %5 {strides = array<i32>} : memref<8x256xf32, #tpu.memory_space<vmem>>, vector<8x256xf32>,
    return
  }
  func.func @transform_0(%arg0: i32, %arg1: i32) -> (i32, i32) {
    %c0_i32 = arith.constant 0 : i32
    %c0_i32_0 = arith.constant 0 : i32
    return %arg1, %c0_i32 : i32, i32
  }
  func.func @transform_1(%arg0: i32, %arg1: i32) -> (i32, i32) {
    %c0_i32 = arith.constant 0 : i32
    %c0_i32_0 = arith.constant 0 : i32
    return %c0_i32, %arg0 : i32, i32
  }
  func.func @transform_2(%arg0: i32, %arg1: i32) -> (i32, i32) {
    %c0_i32 = arith.constant 0 : i32
    %c0_i32_0 = arith.constant 0 : i32
    return %c0_i32, %arg0 : i32, i32
  }
  func.func @transform_3(%arg0: i32, %arg1: i32) -> (i32, i32) {
    %c0_i32 = arith.constant 0 : i32
    return %arg1, %arg0 : i32, i32
  }
}

</mosaic_0001>

<bundles_post_ra>
// kernel: tpu_custom_call.1
= control target key start
LH: loop header
LB: loop body
LE: loop exit
PB: predicated region body
PF: predicated region fallthrough
CT: control target
= control target key end

     0   :  { %8 = vsyncpa [#allocation3], 0  ;;  %s303_s0 = inlined_call_operand.hbm [shape: bf16[8,32], index: 0, kind: input, shape index: {}]   ;;  %s304_s1 = inlined_call_operand.hbm [shape: bf16[32,256], index: 1, kind: input, shape index: {}]   ;;  %s305_s2 = inlined_call_operand.vmem [shape: f32[1,256], index: 2, kind: input, shape index: {}]   ;;  %s306_s3 = inlined_call_operand.hbm [shape: f32[8,256], index: 3, kind: output, shape index: {}]  }
   0x1   :  { %9 = vsyncpa [#allocation6], 0 }
   0x2   :  { %10 = vsyncpa [#allocation4], 0  ;;  %s231_s12 = smov [#allocation2]   ;;  %s232_s14 = smov [#allocation5]  }
   0x3   :  { %s17_s13 = sshll.u32 %s231_s12, 4  ;;  %s26_s15 = sshll.u32 %s232_s14, 4  ;;  %s18_s13 = int_to_ptr.vmem [resolvable:$true] %s17_s13  ;;  %s257_s15 = int_to_ptr.vmem [resolvable:$true] %s26_s15 }
   0x4   :  { %s159_s18 = scalar_lea.hbm %s303_s0, 64 }
   0x5   :  { %p160_p0 = scmp.ne.s32.totalorder %s303_s0, %s159_s18  ;;  %p163_p1 = scmp.lt.u32.totalorder %s159_s18, %s303_s0 }
   0x7   :  { %p165_p2 = pnand %p163_p1, %p160_p0 }
   0x9   :  { %168 = shalt.err (!%p165_p2)
}
   0xa   :  { %s169_s23 = scalar_lea.vmem %s18_s13, 64  ;;  %p174_p4 = scmp.lt.s32.totalorder %s18_s13, %s18_s13 }
   0xb   :  { %p170_p3 = scmp.ne.s32.totalorder %s18_s13, %s169_s23  ;;  %p175_p5 = scmp.lt.s32.totalorder %s169_s23, %s169_s23 }
   0xd   :  { %p176_p6 = por %p175_p5, %p174_p4 }
   0xf   :  { %p177_p7 = pnand %p176_p6, %p170_p3 }
  0x11   :  { %180 = shalt.err (!%p177_p7)
}
  0x12   :  { %20 = dma.hbm_to_vmem [thread:$0]  %s303_s0, 64, %s18_s13, [#allocation3]  }
  0x13   :  { %s181_s28 = scalar_lea.hbm %s304_s1, 512 }
  0x14   :  { %p182_p8 = scmp.ne.s32.totalorder %s304_s1, %s181_s28  ;;  %p185_p9 = scmp.lt.u32.totalorder %s181_s28, %s304_s1 }
  0x16   :  { %p187_p10 = pnand %p185_p9, %p182_p8 }
  0x18   :  { %190 = shalt.err (!%p187_p10)
}
  0x19   :  { %s191_s6 = scalar_lea.vmem %s257_s15, 512  ;;  %p196_p12 = scmp.lt.s32.totalorder %s257_s15, %s257_s15 }
  0x1a   :  { %p192_p11 = scmp.ne.s32.totalorder %s257_s15, %s191_s6  ;;  %p197_p13 = scmp.lt.s32.totalorder %s191_s6, %s191_s6 }
  0x1c   :  { %p198_p0 = por %p197_p13, %p196_p12 }
  0x1e   :  { %p199_p1 = pnand %p198_p0, %p192_p11 }
  0x20   :  { %202 = shalt.err (!%p199_p1)
}
  0x21   :  { %s233_s0 = smov 128   ;;  %s234_s7 = smov 8  }
  0x22   :  { %32 = dma.hbm_to_vmem [thread:$0]  %s304_s1, 512, %s257_s15, [#allocation6], %s233_s0, %s233_s0, %s234_s7  }
  0x23   :  { %225 = dma.done.wait [#allocation3], 64  }
  0x24   :  { %226 = vsyncadd [#allocation3], 4294967232 }
  0x25   :  { %227 = dma.done.wait [#allocation6], 512  }
  0x26   :  { %228 = vsyncadd [#allocation6], 4294966784  ;;  %v235_v0 = vmov 0   ;;  %v153_v1 = vld [vmem:[#allocation5 + $0x4] ss:$8 sps:$4 sm:$0xff]   ;;  %vm79_vm0 = vcmask 261120   ;;  %v49_v6 = vlaneseq }
  0x27   :  { %115 = vmatprep.mubr.bf16.mxu0 %v235_v0  ;;  %v155_v2 = vld [vmem:[#allocation5] ss:$8 sps:$4 sm:$0xff]   ;;  %83 = vmatprep.subr.bf16.mxu0 %v153_v1  ;;  %v156_v3 = vld [vmem:[#allocation5 + $0x14] ss:$8 sps:$4 sm:$0xff]   ;;  %v158_v4 = vld [vmem:[#allocation5 + $0x10] ss:$8 sps:$4 sm:$0xff]  }
  0x28   :  { %84 = vmatpush1.bf16.msra.mxu0 %v155_v2  ;;  %v42_v5 = vld [vmem:[#allocation2] sm:$0xf]  ;;  %v50_v7 = vshrl.u32 %v49_v6, 7  ;;  %s236_s11 = smov [#allocation7]  }
  0x29   :  { %85 = vmatprep.subr.bf16.mxu0 %v156_v3  ;;  %v47_v9 = vld [vmem:[%s305_s2] sm:$0x3]  ;;  %s132_s12 = sshll.u32 %s236_s11, 4  ;;  %s133_s12 = int_to_ptr.vmem [resolvable:$true] %s132_s12 }
  0x2a   :  { %v51_v8 = vsub.s32 0, %v50_v7  ;;  %v55_v10 = vsub.s32 1, %v50_v7  ;;  %s203_s13 = scalar_lea.vmem %s133_s12, 256  ;;  %p208_p3 = scmp.lt.s32.totalorder %s133_s12, %s133_s12 }
  0x2b   :  { %p204_p2 = scmp.ne.s32.totalorder %s133_s12, %s203_s13  ;;  %p209_p4 = scmp.lt.s32.totalorder %s203_s13, %s203_s13 }
  0x2c   :  { %86 = vmatpush1.bf16.msra.mxu0 %v158_v4  ;;  %v52_v11 = vrot.slane %v47_v9, %v51_v8  ;;  %v56_v12 = vrot.slane %v47_v9, %v55_v10 }
  0x2d   :  { %p210_p5 = por %p209_p4, %p208_p3 }
  0x2f   :  { %146 = vmatmul.mubr.msk.bf16.vlgmr.msra.gmra.mrb[0].mxu0 %vm79_vm0, %v42_v5  ;;  %p211_p6 = pnand %p210_p5, %p204_p2 }
 0x102   :  { %v117_v13 = vpop.f32.mrb[0].mxu0 }
 0x103   :  { %v118_v14 = vadd.f32 %v117_v13, %v52_v11  ;;  %v119_v15 = vpop.f32.mrb[1].mxu0 }
 0x104   :  { %v120_v16 = vadd.f32 %v119_v15, %v56_v12  ;;  %v121_v17 = vpop.f32.mrb[2].mxu0 }
 0x105   :  { %124 = vst [vmem:[#allocation7] sm:$0xff] %v118_v14  ;;  %v122_v18 = vpop.f32.mrb[3].mxu0 }
 0x106   :  { %125 = vst [vmem:[#allocation7 + $0x8] sm:$0xff] %v120_v16 }
 0x107   :  { %214 = shalt.err (!%p211_p6)
}
 0x108   :  { %s215_s15 = scalar_lea.hbm %s306_s3, 256 }
 0x109   :  { %p216_p7 = scmp.ne.s32.totalorder %s306_s3, %s215_s15  ;;  %p219_p8 = scmp.lt.u32.totalorder %s215_s15, %s306_s3 }
 0x10b   :  { %p221_p9 = pnand %p219_p8, %p216_p7 }
 0x10d   :  { %224 = shalt.err (!%p221_p9)
}
 0x10e   :  { %135 = dma.vmem_to_hbm [thread:$0]  %s133_s12, 256, %s306_s3, [#allocation4]  }
 0x10f   :  { %229 = dma.done.wait [#allocation4], 256  }
 0x110   :  { %230 = vsyncadd [#allocation4], 4294967040 }
 0x111   :  { %139 = vsyncpa [#allocation3], 1 }
 0x112   :  { %140 = vsyncpa [#allocation6], 1 }
 0x113   :  { %141 = vsyncpa [#allocation4], 1 }

</bundles_post_ra>
